<compile_context>
chip_gen: v7x
topology: tpu7x:2x2x1
jax: 0.10.0
libtpu: 0.0.40
codegen_flags: <defaults>
</compile_context>

<pallas_src>
import functools

import jax
import jax.numpy as jnp
from jax.experimental import pallas as pl
from jax.experimental.pallas import tpu as pltpu


def _round_up(x, m):
    return (x + m - 1) // m * m


def _mlp_sigmoid_kernel(xT_ref, w1T_ref, b1_ref, w2T_ref, b2_ref, w3_ref,
                        b3_ref, o_ref):
    # Layer 1: bf16 MXU matmul, f32 accumulation. xT: [Fp, TB], w1T: [64, Fp].
    h1 = jnp.dot(w1T_ref[...], xT_ref[...],
                 preferred_element_type=jnp.float32)          # [64, TB] f32
    h1 = jnp.maximum(h1 + b1_ref[...], 0.0)                   # bias/ReLU in f32

    # Layer 2: re-cast the activation to bf16 for the MXU, accumulate in f32.
    h2 = jnp.dot(w2T_ref[...], h1.astype(jnp.bfloat16),
                 preferred_element_type=jnp.float32)          # [4, TB] f32
    h2 = jnp.maximum(h2 + b2_ref[...], 0.0)

    # Layer 3 (4 -> 1): broadcast multiply + 4-row sublane reduce on VPU/XLU,
    # lane-dense result.  b3 is a scalar living in SMEM.
    z = jnp.sum(h2 * w3_ref[...], axis=0, keepdims=True) + b3_ref[0, 0]
    o_ref[...] = jax.nn.sigmoid(z)                            # [1, TB] f32


@functools.partial(jax.jit, static_argnames=("block_b",))
def gnn_forward(x, params, *, block_b=16384):
    """x: [B, 6N-3] float32 (pre-BFS-encoded trees). Returns [B, 1] sigmoid preds."""
    w1, b1, w2, b2, w3, b3 = params
    B, F = x.shape
    H1 = w1.shape[1]                       # 64
    H2 = w2.shape[1]                       # 4

    # --- host-side layout prep (one pass over x: cast + transpose + pad) ----
    Fp = _round_up(F, 16)                  # 45 -> 48 (bf16 sublane packing)
    tb_cap = _round_up(max(block_b, 256), 256)
    TB = min(tb_cap, _round_up((B + 1) // 2, 256))   # >=2 tiles once B is big (v7x)
    Bp = _round_up(B, TB)
    num_tiles = Bp // TB

    xT_in = jnp.pad(x.astype(jnp.bfloat16).T,
                    ((0, Fp - F), (0, Bp - B)))               # [Fp, Bp] bf16
    w1T = jnp.pad(w1, ((0, Fp - F), (0, 0))).T.astype(jnp.bfloat16)   # [64, Fp]
    b1c = b1.reshape(H1, 1)                                   # [64, 1] f32
    w2T = w2.T.astype(jnp.bfloat16)                           # [4, 64] bf16
    b2c = b2.reshape(H2, 1)                                   # [4, 1] f32
    w3c = w3.reshape(H2, 1)                                   # [4, 1] f32
    b3s = b3.reshape(1, 1)                                    # scalar -> SMEM

    # --- specs --------------------------------------------------------------
    const = lambda i: (0, 0)
    in_specs = [
        pl.BlockSpec((Fp, TB), lambda i: (0, i)),             # x tile (bf16)
        pl.BlockSpec((H1, Fp), const),                        # w1^T (resident)
        pl.BlockSpec((H1, 1), const),                         # b1
        pl.BlockSpec((H2, H1), const),                        # w2^T
        pl.BlockSpec((H2, 1), const),                         # b2
        pl.BlockSpec((H2, 1), const),                         # w3 column
        pl.BlockSpec(memory_space=pltpu.MemorySpace.SMEM),    # b3 scalar
    ]
    out_specs = pl.BlockSpec((1, TB), lambda i: (0, i))       # lane-dense output

    cost = pl.CostEstimate(
        flops=2 * Bp * (Fp * H1 + H1 * H2 + H2),
        transcendentals=Bp,                                   # sigmoid exp
        bytes_accessed=(Bp * Fp * 2 + Bp * 4
                        + (H1 * Fp + H2 * H1) * 2
                        + (H1 + H2 + H2 + 1) * 4),
    )

    out = pl.pallas_call(
        _mlp_sigmoid_kernel,
        out_shape=jax.ShapeDtypeStruct((1, Bp), jnp.float32),
        grid=(num_tiles,),
        in_specs=in_specs,
        out_specs=out_specs,
        compiler_params=pltpu.CompilerParams(
            dimension_semantics=("parallel",)),               # shard batch on v7x
        cost_estimate=cost,
    )(xT_in, w1T, b1c, w2T, b2c, w3c, b3s)

    return out[0, :B].reshape(B, 1)


def init_params(N, key):
    """Deterministic init matching PyTorch Linear default (U[-1/sqrt(fan_in), ...])."""
    size = 6 * N - 3
    dims = [(size, 64), (64, 4), (4, 1)]
    params = []
    for fan_in, fan_out in dims:
        kw, kb, key = jax.random.split(key, 3)
        bound = 1.0 / jnp.sqrt(float(fan_in))
        w = jax.random.uniform(kw, (fan_in, fan_out), jnp.float32, -bound, bound)
        b = jax.random.uniform(kb, (1, fan_out), jnp.float32, -bound, bound)
        params += [w, b]
    return tuple(params)


def reference_forward(x, params):
    """Pure-JAX reference mirroring the kernel's bf16 MXU operands / f32 accumulation."""
    w1, b1, w2, b2, w3, b3 = params
    xq = x.astype(jnp.bfloat16)
    h1 = jnp.dot(xq, w1.astype(jnp.bfloat16),
                 preferred_element_type=jnp.float32)
    h1 = jnp.maximum(h1 + b1, 0.0)
    h2 = jnp.dot(h1.astype(jnp.bfloat16), w2.astype(jnp.bfloat16),
                 preferred_element_type=jnp.float32)
    h2 = jnp.maximum(h2 + b2, 0.0)
    z = jnp.sum(h2 * w3.reshape(1, -1), axis=-1, keepdims=True) + b3.reshape(1, 1)
    return jax.nn.sigmoid(z)


if __name__ == "__main__":
    N = 8                        # samples per tree -> size = 6*8-3 = 45
    B = 300                      # trees; non-multiple of the tile -> tests padding
    size = 6 * N - 3

    key = jax.random.PRNGKey(0)
    kp, kn, kt = jax.random.split(key, 3)
    params = init_params(N, kp)

    # Synthetic BFS encodings: [counts | times | leaf-flags] per tree.
    n_nodes = 2 * N - 1
    ns = jax.random.randint(kn, (B, n_nodes), 1, N + 1).astype(jnp.float32)
    ts = jax.random.uniform(kt, (B, n_nodes), jnp.float32, 0.0, 10.0)
    zs = (ns == 1).astype(jnp.float32)
    x = jnp.concatenate([ns, ts, zs], axis=1)          # [B, 6N-3]
    assert x.shape == (B, size)

    # Small tile (256 rows) so the demo exercises a multi-step grid (2 tiles).
    preds = gnn_forward(x, params, block_b=256)
    preds = jax.block_until_ready(preds)

    ref = reference_forward(x, params)
    assert preds.shape == (B, 1)
    assert jnp.allclose(preds, ref, atol=2e-3, rtol=2e-3), (preds, ref)
    print("KERNEL_OK")
</pallas_src>

<mosaic_0001>
module attributes {stable_mosaic.version = 11 : i64} {
  func.func @_mlp_sigmoid_kernel(%arg0: i32, %arg1: memref<48x256xbf16, #tpu.memory_space<vmem>>, %arg2: memref<64x48xbf16, #tpu.memory_space<vmem>>, %arg3: memref<64x1xf32, #tpu.memory_space<vmem>>, %arg4: memref<4x64xbf16, #tpu.memory_space<vmem>>, %arg5: memref<4x1xf32, #tpu.memory_space<vmem>>, %arg6: memref<4x1xf32, #tpu.memory_space<vmem>>, %arg7: memref<1x1xf32, #tpu.memory_space<smem>>, %arg8: memref<1x256xf32, #tpu.memory_space<vmem>>) attributes {dimension_semantics = [#tpu.dimension_semantics<parallel>], iteration_bounds = array<i64: 2>, scalar_prefetch = 0 : i64, scratch_operands = 0 : i64, tpu.core_type = #tpu.core_type<tc>, window_params = [{transform_indices = @transform_0, window_bounds = array<i64: 48, 256>}, {pipeline_mode = #tpu.pipeline_mode<synchronous>, transform_indices = @transform_1, window_bounds = array<i64: 64, 48>}, {pipeline_mode = #tpu.pipeline_mode<synchronous>, transform_indices = @transform_2, window_bounds = array<i64: 64, 1>}, {pipeline_mode = #tpu.pipeline_mode<synchronous>, transform_indices = @transform_3, window_bounds = array<i64: 4, 64>}, {pipeline_mode = #tpu.pipeline_mode<synchronous>, transform_indices = @transform_4, window_bounds = array<i64: 4, 1>}, {pipeline_mode = #tpu.pipeline_mode<synchronous>, transform_indices = @transform_5, window_bounds = array<i64: 4, 1>}, {transform_indices = @transform_6, window_bounds = array<i64: 1, 1>}, {transform_indices = @transform_7, window_bounds = array<i64: 1, 256>}]} {
    %c0 = arith.constant 0 : index
    %c0_0 = arith.constant 0 : index
    %0 = vector.load %arg2[%c0, %c0_0] : memref<64x48xbf16, #tpu.memory_space<vmem>>, vector<64x48xbf16>
    %c0_1 = arith.constant 0 : index
    %c0_2 = arith.constant 0 : index
    %1 = vector.load %arg1[%c0_1, %c0_2] : memref<48x256xbf16, #tpu.memory_space<vmem>>, vector<48x256xbf16>
    %cst = arith.constant dense<0.000000e+00> : vector<64x256xf32>
    %2 = tpu.matmul %0, %1, %cst {dimension_numbers = #tpu.dot_dimension_numbers<[1], [0], [0], [1], [0, 0, 1, 1], [], []>} : vector<64x48xbf16>, vector<48x256xbf16>, vector<64x256xf32> -> vector<64x256xf32>
    %c0_3 = arith.constant 0 : index
    %c0_4 = arith.constant 0 : index
    %3 = vector.load %arg3[%c0_3, %c0_4] : memref<64x1xf32, #tpu.memory_space<vmem>>, vector<64x1xf32>
    %4 = vector.broadcast %3 : vector<64x1xf32> to vector<64x256xf32>
    %5 = arith.addf %2, %4 : vector<64x256xf32>
    %cst_5 = arith.constant 0.000000e+00 : f32
    %6 = vector.broadcast %cst_5 : f32 to vector<64x256xf32>
    %7 = arith.maximumf %5, %6 : vector<64x256xf32>
    %c0_6 = arith.constant 0 : index
    %c0_7 = arith.constant 0 : index
    %8 = vector.load %arg4[%c0_6, %c0_7] : memref<4x64xbf16, #tpu.memory_space<vmem>>, vector<4x64xbf16>
    %9 = arith.truncf %7 : vector<64x256xf32> to vector<64x256xbf16>
    %cst_8 = arith.constant dense<0.000000e+00> : vector<4x256xf32>
    %10 = tpu.matmul %8, %9, %cst_8 {dimension_numbers = #tpu.dot_dimension_numbers<[1], [0], [0], [1], [0, 0, 1, 1], [], []>} : vector<4x64xbf16>, vector<64x256xbf16>, vector<4x256xf32> -> vector<4x256xf32>
    %c0_9 = arith.constant 0 : index
    %c0_10 = arith.constant 0 : index
    %11 = vector.load %arg5[%c0_9, %c0_10] : memref<4x1xf32, #tpu.memory_space<vmem>>, vector<4x1xf32>
    %12 = vector.broadcast %11 : vector<4x1xf32> to vector<4x256xf32>
    %13 = arith.addf %10, %12 : vector<4x256xf32>
    %cst_11 = arith.constant 0.000000e+00 : f32
    %14 = vector.broadcast %cst_11 : f32 to vector<4x256xf32>
    %15 = arith.maximumf %13, %14 : vector<4x256xf32>
    %c0_12 = arith.constant 0 : index
    %c0_13 = arith.constant 0 : index
    %16 = vector.load %arg6[%c0_12, %c0_13] : memref<4x1xf32, #tpu.memory_space<vmem>>, vector<4x1xf32>
    %17 = vector.broadcast %16 : vector<4x1xf32> to vector<4x256xf32>
    %18 = arith.mulf %15, %17 : vector<4x256xf32>
    %cst_14 = arith.constant dense<0.000000e+00> : vector<256xf32>
    %19 = vector.multi_reduction <add>, %18, %cst_14 [0] : vector<4x256xf32> to vector<256xf32>
    %20 = vector.shape_cast %19 : vector<256xf32> to vector<1x256xf32>
    %c0_15 = arith.constant 0 : index
    %c0_16 = arith.constant 0 : index
    %21 = memref.load %arg7[%c0_15, %c0_16] : memref<1x1xf32, #tpu.memory_space<smem>>
    %22 = vector.broadcast %21 : f32 to vector<1x256xf32>
    %23 = arith.addf %20, %22 : vector<1x256xf32>
    %24 = arith.negf %23 : vector<1x256xf32>
    %25 = math.exp %24 : vector<1x256xf32>
    %cst_17 = arith.constant 1.000000e+00 : f32
    %26 = vector.broadcast %cst_17 : f32 to vector<1x256xf32>
    %27 = arith.addf %26, %25 : vector<1x256xf32>
    %28 = arith.divf %26, %27 : vector<1x256xf32>
    %c0_18 = arith.constant 0 : index
    %c0_19 = arith.constant 0 : index
    %29 = vector.load %arg8[%c0_18, %c0_19] : memref<1x256xf32, #tpu.memory_space<vmem>>, vector<1x256xf32>
    tpu.vector_store %arg8[%c0_18, %c0_19], %28 {strides = array<i32>} : memref<1x256xf32, #tpu.memory_space<vmem>>, vector<1x256xf32>,
    return
  }
  func.func @transform_0(%arg0: i32) -> (i32, i32) {
    %c0_i32 = arith.constant 0 : i32
    %c0_i32_0 = arith.constant 0 : i32
    return %c0_i32, %arg0 : i32, i32
  }
  func.func @transform_1(%arg0: i32) -> (i32, i32) {
    %c0_i32 = arith.constant 0 : i32
    %c0_i32_0 = arith.constant 0 : i32
    %c0_i32_1 = arith.constant 0 : i32
    return %c0_i32, %c0_i32_0 : i32, i32
  }
  func.func @transform_2(%arg0: i32) -> (i32, i32) {
    %c0_i32 = arith.constant 0 : i32
    %c0_i32_0 = arith.constant 0 : i32
    %c0_i32_1 = arith.constant 0 : i32
    return %c0_i32, %c0_i32_0 : i32, i32
  }
  func.func @transform_3(%arg0: i32) -> (i32, i32) {
    %c0_i32 = arith.constant 0 : i32
    %c0_i32_0 = arith.constant 0 : i32
    %c0_i32_1 = arith.constant 0 : i32
    return %c0_i32, %c0_i32_0 : i32, i32
  }
  func.func @transform_4(%arg0: i32) -> (i32, i32) {
    %c0_i32 = arith.constant 0 : i32
    %c0_i32_0 = arith.constant 0 : i32
    %c0_i32_1 = arith.constant 0 : i32
    return %c0_i32, %c0_i32_0 : i32, i32
  }
  func.func @transform_5(%arg0: i32) -> (i32, i32) {
    %c0_i32 = arith.constant 0 : i32
    %c0_i32_0 = arith.constant 0 : i32
    %c0_i32_1 = arith.constant 0 : i32
    return %c0_i32, %c0_i32_0 : i32, i32
  }
  func.func @transform_6(%arg0: i32) -> (i32, i32) {
    %c0_i32 = arith.constant 0 : i32
    %c0_i32_0 = arith.constant 0 : i32
    %c0_i32_1 = arith.constant 0 : i32
    return %c0_i32, %c0_i32_0 : i32, i32
  }
  func.func @transform_7(%arg0: i32) -> (i32, i32) {
    %c0_i32 = arith.constant 0 : i32
    %c0_i32_0 = arith.constant 0 : i32
    return %c0_i32, %arg0 : i32, i32
  }
}

</mosaic_0001>

<bundles_post_ra>
// kernel: gnn_forward.1
= control target key start
LH: loop header
LB: loop body
LE: loop exit
PB: predicated region body
PF: predicated region fallthrough
CT: control target
= control target key end

     0   :  { %s979_s0 = inlined_call_operand.vmem [shape: bf16[48,512], index: 0, kind: input, shape index: {}]   ;;  %s980_s1 = inlined_call_operand.vmem [shape: bf16[64,48], index: 1, kind: input, shape index: {}]   ;;  %s981_s2 = inlined_call_operand.vmem [shape: f32[64,1], index: 2, kind: input, shape index: {}]   ;;  %s982_s3 = inlined_call_operand.vmem [shape: bf16[4,64], index: 3, kind: input, shape index: {}]   ;;  %s983_s4 = inlined_call_operand.vmem [shape: f32[4,1], index: 4, kind: input, shape index: {}]   ;;  %s984_s5 = inlined_call_operand.vmem [shape: f32[4,1], index: 5, kind: input, shape index: {}]   ;;  %s985_s6 = inlined_call_operand.<no memory space> [shape: f32[1,1], index: 6, kind: input, shape index: {}]   ;;  %s986_s7 = inlined_call_operand.vmem [shape: f32[1,512], index: 7, kind: output, shape index: {}]  }
   0x1   :  { %12 = sst [smem:[#allocation2]] %s985_s6 }
   0x2   :  { %s878_s26 = smov 0   ;;  %s880_s27 = smov 0  }
   0x3   :  { %s882_s28 = smov 0  }
   0x4 LB: > { %s730_s6 = sadd.s32 4294967295, %s831_s28   ;;  %s895_s29 = sadd.s32 1, %s831_s28   ;;  %s831_s28 = sphi %s882_s28, %s989_s28   ;;  %s827_s27 = sphi %s880_s27, %s988_s27   ;;  %s823_s26 = sphi %s878_s26, %s987_s26  }
   0x5   : > { %s22_s30 = ssub.s32 %s831_s28, %s895_s29  ;;  %s25_s8 = sadd.s32 1, %s827_s27 }
   0x6   : > { %p23_p0 = scmp.eq.s32.totalorder %s22_s30, 0  ;;  %p32_p1 = scmp.ne.s32.totalorder %s827_s27, %s823_s26 }
   0x7   : > { %p33_p2 = scmp.eq.s32.totalorder %s831_s28, 0  ;;  %p733_p4 = scmp.ge.s32.totalorder %s831_s28, 2 }
   0x8   : > { %s904_s9 = scalar_select %p23_p0, %s827_s27, %s25_s8  }
   0x9   : > { %p34_p3 = por %p33_p2, %p32_p1  ;;  %228 = sbr.rel (%p733_p4) target bundleno = 23 (0x17), region = 40 }
  0x10   : > { %231 = sbr.rel (!%p34_p3) target bundleno = 23 (0x17), region = 44  ;;  %s233_s10 = sand.u32 (%p34_p3), 1, %s827_s27  }
  0x11   : > { %s757_s11 = sshll.u32 (%p34_p3), %s831_s28, 3  ;;  %s758_s12 = smul.u32 (%p34_p3), 48, %s233_s10 }
  0x12   : > { %s238_s15 = scalar_lea.vmem (%p34_p3), %s979_s0, %s757_s11 }
  0x13   : > { %v276_v0 = vld [vmem:[%s238_s15] sm:$0xff] (%p34_p3)  ;;  %v278_v1 = vld [vmem:[%s238_s15 + $0x10] sm:$0xff] (%p34_p3)  ;;  %s235_s16 = scalar_lea.vmem (%p34_p3), [#allocation3], %s758_s12 }
  0x14   : > { %v280_v2 = vld [vmem:[%s238_s15 + $0x20] sm:$0xff] (%p34_p3)  ;;  %v282_v3 = vld [vmem:[%s238_s15 + $0x30] sm:$0xff] (%p34_p3)  ;;  %277 = vst [vmem:[%s235_s16] sm:$0xff] (%p34_p3), %v276_v0  ;;  %279 = vst [vmem:[%s235_s16 + $0x8] sm:$0xff] (%p34_p3), %v278_v1 }
  0x15   : > { %v284_v4 = vld [vmem:[%s238_s15 + $0x40] sm:$0xff] (%p34_p3)  ;;  %v286_v5 = vld [vmem:[%s238_s15 + $0x50] sm:$0xff] (%p34_p3)  ;;  %281 = vst [vmem:[%s235_s16 + $0x10] sm:$0xff] (%p34_p3), %v280_v2  ;;  %283 = vst [vmem:[%s235_s16 + $0x18] sm:$0xff] (%p34_p3), %v282_v3 }
  0x16   : > { %285 = vst [vmem:[%s235_s16 + $0x20] sm:$0xff] (%p34_p3), %v284_v4  ;;  %287 = vst [vmem:[%s235_s16 + $0x28] sm:$0xff] (%p34_p3), %v286_v5 }
  0x17 PF: > { %p736_p5 = scmp.ge.s32.totalorder %s831_s28, 1  ;;  %p292_p6 = scmp.lt.s32.totalorder %s831_s28, 3 }
  0x19   : > { %p293_p7 = pnand %p736_p5, %p292_p6 }
  0x1a   : > { %s299_s17 = sand.u32 (!%p293_p7), 1, %s823_s26   ;;  %v833_v6 = vmov (!%p293_p7), 0   ;;  %v350_v12 = vld [vmem:[%s981_s2] sm:$0xff] (!%p293_p7)  ;;  %v352_v13 = vld [vmem:[%s981_s2 + $0x10] sm:$0xff] (!%p293_p7)  ;;  %v351_v14 = vld [vmem:[%s981_s2 + $0x8] sm:$0xff] (!%p293_p7)  ;;  %vm448_vm0 = vcmask (!%p293_p7), 392192  }
  0x1b   : > { %296 = sbr.rel (%p293_p7) target bundleno = 560 (0x230), region = 82  ;;  %493 = vmatprep.mubr.bf16.mxu0 (!%p293_p7), %v833_v6  ;;  %786 = vset.pattern.permute.xlu0 (!%p293_p7), %v833_v6  ;;  %v353_v15 = vld [vmem:[%s981_s2 + $0x18] sm:$0xff] (!%p293_p7)  ;;  %v797_v17 = vld [vmem:[%s980_s1] sm:$0xff] (!%p293_p7)   ;;  %v355_v19 = vld [vmem:[%s981_s2 + $0x28] sm:$0xff] (!%p293_p7)  ;;  %vm565_vm1 = vcmask (!%p293_p7), 523264   ;;  %vm620_vm2 = vcmask (!%p293_p7), 1043456  }
  0x1c   : > { %s759_s18 = smul.u32 (!%p293_p7), 48, %s299_s17  ;;  %787 = vset.pattern.permute.xlu1 (!%p293_p7), %v833_v6  ;;  %601 = vmatprep.mubr.bf16.mxu1 (!%p293_p7), %v833_v6  ;;  %v354_v18 = vld [vmem:[%s981_s2 + $0x20] sm:$0xff] (!%p293_p7)  ;;  %v356_v20 = vld [vmem:[%s981_s2 + $0x30] sm:$0xff] (!%p293_p7)  ;;  %v357_v21 = vld [vmem:[%s981_s2 + $0x38] sm:$0xff] (!%p293_p7)  ;;  %s635_s12 = sld [smem:[#allocation2]] (!%p293_p7) }
  0x1d   : > { %360 = vperm.xlu0 (!%p293_p7), %786, %v350_v12   ;;  %370 = vperm.xlu1 (!%p293_p7), %787, %v352_v13   ;;  %v798_v22 = vld [vmem:[%s980_s1 + $0x8] sm:$0xff] (!%p293_p7)   ;;  %v559_v23 = vld [vmem:[%s983_s4] sm:$0xf] (!%p293_p7)  ;;  %v799_v25 = vld [vmem:[%s980_s1 + $0x10] sm:$0xff] (!%p293_p7)   ;;  %s737_s13 = sshll.u32 (!%p293_p7), %s730_s6, 1 }
  0x1e   : > { %s301_s19 = scalar_lea.vmem (!%p293_p7), [#allocation3], %s759_s18  ;;  %v612_v24 = vld [vmem:[%s984_s5] sm:$0xf] (!%p293_p7)  ;;  %v800_v26 = vld [vmem:[%s980_s1 + $0x18] sm:$0xff] (!%p293_p7)   ;;  %p331_p8 = scmp.lt.s32.totalorder (!%p293_p7), %s737_s13, 3 }
  0x1f   : > { %v788_v7 = vld [vmem:[%s301_s19 + $0x4] ss:$8 sps:$4 sm:$0xff] (!%p293_p7)   ;;  %v790_v8 = vld [vmem:[%s301_s19] ss:$8 sps:$4 sm:$0xff] (!%p293_p7)   ;;  %v791_v9 = vld [vmem:[%s301_s19 + $0x14] ss:$8 sps:$4 sm:$0xff] (!%p293_p7)  }
  0x20   : > { %461 = vmatprep.subr.bf16.mxu0 (!%p293_p7), %v788_v7  ;;  %v793_v10 = vld [vmem:[%s301_s19 + $0x10] ss:$8 sps:$4 sm:$0xff] (!%p293_p7)   ;;  %v794_v11 = vld [vmem:[%s301_s19 + $0x24] ss:$8 sps:$4 sm:$0xff] (!%p293_p7)   ;;  %v796_v16 = vld [vmem:[%s301_s19 + $0x20] ss:$8 sps:$4 sm:$0xff] (!%p293_p7)  }
  0x21   : > { %462 = vmatpush1.bf16.msra.mxu0 (!%p293_p7), %v790_v8  ;;  %365 = vperm.xlu0 (!%p293_p7), %786, %v351_v14  }
  0x22   : > { %463 = vmatprep.subr.bf16.mxu0 %v791_v9  ;;  %375 = vperm.xlu1 %787, %v353_v15   ;;  %s991_s13 = smov (!%p331_p8, %s737_s13), 3 }
  0x23   : > { %s333_s16 = scalar_lea.vmem %s986_s7, %s991_s13 }
  0x25   : > { %464 = vmatpush1.bf16.msra.mxu0 %v793_v10  ;;  %380 = vperm.xlu0 %786, %v354_v18  }
  0x26   : > { %465 = vmatprep.subr.bf16.mxu0 %v794_v11  ;;  %385 = vperm.xlu1 %787, %v355_v19  }
  0x29   : > { %466 = vmatpush1.bf16.msra.mxu0 %v796_v16  ;;  %390 = vperm.xlu0 %786, %v356_v20  }
  0x2a   : > { %395 = vperm.xlu1 %787, %v357_v21  }
  0x2c   : > { %748 = vmatmul.mubr.msk.bf16.vlgmr.msra.gmra.mrb[0].mxu0 %vm448_vm0, %v797_v17 }
  0x2d   : > { %503 = vmatprep.mubr.bf16.mxu0 %v833_v6  ;;  %562 = vperm.xlu0 %786, %v559_v23  }
  0x2e   : > { %615 = vperm.xlu1 %787, %v612_v24  }
  0x34   : > { %749 = vmatmul.mubr.msk.bf16.gmra.mrb[4].mxu0 %vm448_vm0, %v798_v22 }
  0x35   : > { %513 = vmatprep.mubr.bf16.mxu0 %v833_v6 }
  0x3c   : > { %750 = vmatmul.mubr.msk.bf16.gmra.mrb[8].mxu0 %vm448_vm0, %v799_v25 }
  0x3d   : > { %523 = vmatprep.mubr.bf16.mxu0 %v833_v6 }
  0x44   : > { %751 = vmatmul.mubr.msk.bf16.gmra.mrb[12].mxu0 %vm448_vm0, %v800_v26 }
  0x9c   : > { %v361_v27 = vpop.permute.xlu0 %360  ;;  %v371_v36 = vpop.permute.xlu1 %370 }
  0xa0   : > { %v366_v31 = vpop.permute.xlu0 %365 }
  0xa1   : > { %v376_v47 = vpop.permute.xlu1 %375 }
  0xa4   : > { %v381_v58 = vpop.permute.xlu0 %380 }
  0xa5   : > { %v386_v63 = vpop.permute.xlu1 %385 }
  0xa8   : > { %v391_v10 = vpop.permute.xlu0 %390 }
  0xa9   : > { %v396_v15 = vpop.permute.xlu1 %395 }
  0xff   : > { %v495_v28 = vpop.f32.mrb[0].mxu0 }
 0x100   : > { %v496_v29 = vadd.f32 %v495_v28, %v361_v27  ;;  %v497_v30 = vpop.f32.mrb[1].mxu0  ;;  %v563_v28 = vpop.permute.xlu0 %562 }
 0x101   : > { %v498_v32 = vadd.f32 %v497_v30, %v361_v27  ;;  %v499_v33 = vpop.f32.mrb[2].mxu0  ;;  %v550_v27 = vld [vmem:[%s982_s3] sm:$0x3] }
 0x102   : > { %v500_v34 = vadd.f32 %v499_v33, %v366_v31  ;;  %v501_v35 = vpop.f32.mrb[3].mxu0  ;;  %v534_v38 = vmax.f32 %v496_v29, 0.0 }
 0x103   : > { %v502_v37 = vadd.f32 %v501_v35, %v366_v31  ;;  %v535_v40 = vmax.f32 %v498_v32, 0.0 }
 0x104   : > { %v536_v39 = vmax.f32 %v500_v34, 0.0 }
 0x105   : > { %v537_v41 = vmax.f32 %v502_v37, 0.0 }
 0x106   : > { %v551_v42 = vpack.c.bf16 %v536_v39, %v534_v38 }
 0x107   : > { %v505_v43 = vpop.f32.mrb[4].mxu0  ;;  %v552_v44 = vpack.c.bf16 %v537_v41, %v535_v40 }
 0x108   : > { %v506_v45 = vadd.f32 %v505_v43, %v371_v36  ;;  %v507_v46 = vpop.f32.mrb[5].mxu0 }
 0x109   : > { %v508_v48 = vadd.f32 %v507_v46, %v371_v36  ;;  %v509_v49 = vpop.f32.mrb[6].mxu0  ;;  %569 = vmatprep.subr.bf16.mxu1 %v552_v44  ;;  %v616_v36 = vpop.permute.xlu1 %615 }
 0x10a   : > { %v510_v50 = vadd.f32 %v509_v49, %v376_v47  ;;  %v511_v51 = vpop.f32.mrb[7].mxu0  ;;  %570 = vmatpush1.bf16.msra.mxu1 %v551_v42  ;;  %v538_v53 = vmax.f32 %v506_v45, 0.0 }
 0x10b   : > { %v512_v52 = vadd.f32 %v511_v51, %v376_v47  ;;  %v539_v55 = vmax.f32 %v508_v48, 0.0  ;;  %v636_v51 = vstv %s635_s12 }
 0x10c   : > { %v540_v54 = vmax.f32 %v510_v50, 0.0 }
 0x10d   : > { %v541_v56 = vmax.f32 %v512_v52, 0.0 }
 0x10e   : > { %v553_v57 = vpack.c.bf16 %v540_v54, %v538_v53 }
 0x10f   : > { %v554_v59 = vpack.c.bf16 %v541_v56, %v539_v55  ;;  %v515_v60 = vpop.f32.mrb[8].mxu0 }
 0x110   : > { %v516_v61 = vadd.f32 %v515_v60, %v381_v58  ;;  %v517_v62 = vpop.f32.mrb[9].mxu0 }
 0x111   : > { %v518_v0 = vadd.f32 %v517_v62, %v381_v58  ;;  %v519_v1 = vpop.f32.mrb[10].mxu0  ;;  %571 = vmatprep.subr.bf16.mxu1 %v554_v59 }
 0x112   : > { %v520_v2 = vadd.f32 %v519_v1, %v386_v63  ;;  %v521_v3 = vpop.f32.mrb[11].mxu0  ;;  %572 = vmatpush1.bf16.msra.mxu1 %v553_v57  ;;  %v542_v5 = vmax.f32 %v516_v61, 0.0  ;;  %v657_v1 = vlaneseq }
 0x113   : > { %v522_v4 = vadd.f32 %v521_v3, %v386_v63  ;;  %v543_v7 = vmax.f32 %v518_v0, 0.0  ;;  %v834_v63 = vmov 1966171168  }
 0x114   : > { %v544_v6 = vmax.f32 %v520_v2, 0.0  ;;  %v655_v0 = vunpack.c.l.s4 %v834_v63  ;;  %v658_v3 = vshrl.u32 %v657_v1, 7  ;;  %vm671_vm3 = vcmp.lt.s32.totalorder %v657_v1, 256 }
 0x115   : > { %v545_v8 = vmax.f32 %v522_v4, 0.0 }
 0x116   : > { %v555_v9 = vpack.c.bf16 %v544_v6, %v542_v5  ;;  %v656_v2 = vunpack.c.0.s8 %v655_v0 }
 0x117   : > { %v556_v11 = vpack.c.bf16 %v545_v8, %v543_v7  ;;  %v525_v12 = vpop.f32.mrb[12].mxu0 }
 0x118   : > { %v526_v13 = vadd.f32 %v525_v12, %v391_v10  ;;  %v527_v14 = vpop.f32.mrb[13].mxu0  ;;  %v659_v5 = vsub.s32 %v656_v2, %v658_v3 }
 0x119   : > { %v528_v16 = vadd.f32 %v527_v14, %v391_v10  ;;  %v529_v17 = vpop.f32.mrb[14].mxu0  ;;  %573 = vmatprep.subr.bf16.mxu1 %v556_v11 }
 0x11a   : > { %v530_v18 = vadd.f32 %v529_v17, %v396_v15  ;;  %v531_v19 = vpop.f32.mrb[15].mxu0  ;;  %574 = vmatpush1.bf16.msra.mxu1 %v555_v9  ;;  %v546_v21 = vmax.f32 %v526_v13, 0.0 }
 0x11b   : > { %v532_v20 = vadd.f32 %v531_v19, %v396_v15  ;;  %v547_v23 = vmax.f32 %v528_v16, 0.0 }
 0x11c   : > { %v548_v22 = vmax.f32 %v530_v18, 0.0 }
 0x11d   : > { %v549_v24 = vmax.f32 %v532_v20, 0.0 }
 0x11e   : > { %v557_v25 = vpack.c.bf16 %v548_v22, %v546_v21 }
 0x11f   : > { %v558_v26 = vpack.c.bf16 %v549_v24, %v547_v23 }
 0x121   : > { %575 = vmatprep.subr.bf16.mxu1 %v558_v26 }
 0x122   : > { %576 = vmatpush1.bf16.msra.mxu1 %v557_v25 }
 0x125   : > { %752 = vmatmul.mubr.msk.bf16.vlgmr.msra.gmra.mrb[0].mxu1 %vm565_vm1, %v550_v27 }
 0x1f8   : > { %v603_v29 = vpop.f32.mrb[0].mxu1 }
 0x1f9   : > { %v604_v30 = vadd.f32 %v603_v29, %v563_v28  ;;  %v605_v31 = vpop.f32.mrb[1].mxu1 }
 0x1fa   : > { %v606_v32 = vadd.f32 %v605_v31, %v563_v28  ;;  %v607_v33 = vpop.f32.mrb[2].mxu1 }
 0x1fb   : > { %v610_v34 = vmax.f32 %v604_v30, 0.0  ;;  %v608_v35 = vpop.f32.mrb[3].mxu1 }
 0x1fc   : > { %v611_v37 = vmax.f32 %v606_v32, 0.0 }
 0x1fd   : > { %v618_v38 = vmul.f32 %v616_v36, %v610_v34 }
 0x1fe   : > { %v619_v39 = vmul.f32 %v616_v36, %v611_v37 }
 0x1ff   : > { %v621_v40 = vsel %vm620_vm2, %v618_v38, 0.0 }
 0x200   : > { %v622_v41 = vrot.slane %v621_v40, 4  ;;  %v628_v42 = vsel %vm620_vm2, %v619_v39, 0.0 }
 0x201   : > { %v629_v43 = vrot.slane %v628_v42, 4 }
 0x202   : > { %v623_v44 = vadd.f32 %v622_v41, %v621_v40 }
 0x203   : > { %v630_v45 = vadd.f32 %v629_v43, %v628_v42 }
 0x204   : > { %v624_v46 = vrot.slane %v623_v44, 2 }
 0x205   : > { %v631_v47 = vrot.slane %v630_v45, 2 }
 0x206   : > { %v625_v48 = vadd.f32 %v624_v46, %v623_v44 }
 0x207   : > { %v632_v49 = vadd.f32 %v631_v47, %v630_v45 }
 0x208   : > { %v626_v50 = vrot.slane %v625_v48, 1 }
 0x209   : > { %v633_v52 = vrot.slane %v632_v49, 1 }
 0x20a   : > { %v627_v53 = vadd.f32 %v626_v50, %v625_v48 }
 0x20b   : > { %v634_v54 = vadd.f32 %v633_v52, %v632_v49 }
 0x20c   : > { %v637_v55 = vadd.f32 %v636_v51, %v627_v53 }
 0x20d   : > { %v638_v56 = vadd.f32 %v636_v51, %v634_v54 }
 0x20e   : > { %v753_v57 = vmul.f32 -1.442695, %v637_v55 }
 0x20f   : > { %v754_v58 = vmul.f32 -1.442695, %v638_v56 }
 0x210   : > { %801 = vpow2.f32 %v753_v57 }
 0x211   : > { %803 = vpow2.f32 %v754_v58 }
 0x21a   : > { %v802_v59 = vpop.eup %801 }
 0x21b   : > { %v804_v60 = vpop.eup %803  ;;  %v645_v61 = vadd.f32 1.0, %v802_v59 }
 0x21c   : > { %v646_v62 = vadd.f32 1.0, %v804_v60 }
 0x21d   : > { %805 = vrcp.f32 %v645_v61 }
 0x21e   : > { %807 = vrcp.f32 %v646_v62 }
 0x227   : > { %v806_v4 = vpop.eup %805 }
 0x228   : > { %v808_v6 = vpop.eup %807 }
 0x229   : > { %v653_v7 = vcombine.low %v806_v4, %v808_v6 }
 0x22b   : > { %v660_v8 = vrot.slane %v653_v7, %v659_v5 }
 0x22d   : > { %v667_v9 = vrot.slane %v660_v8, %v659_v5 }
 0x22f   : > { %673 = vst.msk [vmem:[%s333_s16] sm:$0x3] %vm671_vm3, %v667_v9 }
 0x230 PF: > { %p15_p9 = scmp.ge.s32.totalorder %s895_s29, 4   ;;  %s987_s26 = smov %s827_s27 }
 0x231   : > { %s988_s27 = smov %s904_s9  ;;  %s989_s28 = smov %s895_s29 }
 0x232   :  { %17 = sbr.rel (!%p15_p9) target bundleno = 4 (0x4), region = 121 }

</bundles_post_ra>
